<compile_context>
chip_gen: v7x
topology: tpu7x:2x2x1
jax: 0.10.0
libtpu: 0.0.40
codegen_flags: <defaults>
</compile_context>

<pallas_src>
import functools

import jax
import jax.numpy as jnp
from jax.experimental import pallas as pl
from jax.experimental.pallas import tpu as pltpu


_LOSS_TYPES = ('base', 'online semi-hard', 'online hardest',
               'online hardest adv', 'online hardest v2',
               'online hardest adv v2')

_F32 = jnp.float32
# Clamp on the *squared* L2 norm (|x| >= 1e-12): avoids NaN for all-zero rows.
_EPS = 1e-24


def _pick_block(n, preferred):
    """Largest power-of-two divisor of n that is <= preferred (floor 8), else n."""
    c = preferred
    while c >= 8:
        if n % c == 0:
            return c
        c //= 2
    return n


def _device_defaults():
    try:
        kind = jax.devices()[0].device_kind.lower()
    except Exception:  # pragma: no cover - defensive
        kind = ''
    is_v5e = ('v5 lite' in kind) or ('v5e' in kind) or ('v5litepod' in kind)
    is_v7 = '7' in kind
    bm_pref = 128 if is_v5e else 256          # v5e MXU is 128-wide; v6e/v7x 256-wide
    bn_pref = 512 if is_v5e else 1024
    # scoped-VMEM target, well under physical (64 MiB on v7x, 128 MiB otherwise)
    vmem_budget = (48 << 20) if is_v7 else (96 << 20)
    return bm_pref, bn_pref, vmem_budget


def _make_tiled_kernel(loss_type, margin, lambda_value, d, bm, bn, mm_dtype):
    margin = float(margin)
    lambda_value = float(lambda_value)

    def kernel(anc_ref, pos_ref, neg_ref, invn_ref, idx_ref, stats_ref,
               anc_mm, sim_ap_sc, m_sc, idx_sc):
        j = pl.program_id(1)
        n_j = pl.num_programs(1)

        # ---- per anchor-row-block precompute (first neg chunk only) ----------
        @pl.when(j == 0)
        def _():
            anc32 = anc_ref[...].astype(_F32)                          # (bm, d)
            pos32 = pos_ref[...].astype(_F32)
            inv_a = jax.lax.rsqrt(jnp.maximum(
                jnp.sum(anc32 * anc32, axis=1, keepdims=True), _EPS))  # (bm, 1)
            inv_p = jax.lax.rsqrt(jnp.maximum(
                jnp.sum(pos32 * pos32, axis=1, keepdims=True), _EPS))
            anc_n = anc32 * inv_a                      # fold inv_a into the operand
            anc_mm[...] = anc_n.astype(mm_dtype)
            # sim_ap lane-arranged (1, bm) via one M=1 MXU matmul (no transposes).
            ones_row = jnp.ones((1, d), _F32)
            sim_ap_sc[...] = jax.lax.dot_general(
                ones_row, anc_n * (pos32 * inv_p),
                dimension_numbers=(((1,), (1,)), ((), ())),
                preferred_element_type=_F32)
            m_sc[...] = jnp.full((1, bm), -jnp.inf, _F32)
            idx_sc[...] = jnp.zeros((1, bm), jnp.int32)

        # ---- per (row block, neg chunk) step ---------------------------------
        neg_blk = neg_ref[...]                                         # (bn, d)
        if neg_blk.dtype != mm_dtype:
            neg_blk = neg_blk.astype(mm_dtype)
        # scores[jl, i] = cos(anc[i], neg[j*bn + jl]); inv_a already folded in.
        raw = jax.lax.dot_general(
            neg_blk, anc_mm[...],
            dimension_numbers=(((1,), (1,)), ((), ())),
            preferred_element_type=_F32)                               # (bn, bm)
        scores = raw * invn_ref[...]                                   # (bn,1) bcast

        sim_ap = sim_ap_sc[...]                                        # (1, bm)
        if loss_type == 'online semi-hard':
            x = jnp.maximum(
                jnp.where(scores < sim_ap, margin + scores - sim_ap, 0.0), 0.0)
        elif loss_type in ('online hardest', 'online hardest adv'):
            x = jnp.maximum(margin + scores - sim_ap, 0.0)
        else:  # v2 variants reduce the raw cosine scores
            x = scores

        # Running max + first-occurrence argmax (int32, chunk-local iota).
        cmax = jnp.max(x, axis=0, keepdims=True)                       # (1, bm)
        riota = jax.lax.broadcasted_iota(jnp.int32, (bn, bm), 0)
        cidx = jnp.min(jnp.where(x == cmax, riota, bn),
                       axis=0, keepdims=True) + j * bn                 # (1, bm)
        better = cmax > m_sc[...]
        idx_sc[...] = jnp.where(better, cidx, idx_sc[...])
        m_sc[...] = jnp.where(better, cmax, m_sc[...])

        # ---- finalize & emit (last neg chunk only) ---------------------------
        @pl.when(j == n_j - 1)
        def _():
            cost = m_sc[...]
            idx_row = idx_sc[...]
            sap = sim_ap_sc[...]
            sub8 = jax.lax.broadcasted_iota(jnp.int32, (8, bm), 0)

            def emit(s0, s1=None, s2=None, s3=None):
                idx_ref[...] = idx_row
                tile = jnp.where(sub8 == 0, s0, 0.0)
                if s1 is not None:
                    tile = tile + jnp.where(sub8 == 1, s1, 0.0)
                if s2 is not None:
                    tile = tile + jnp.where(sub8 == 2, s2, 0.0)
                if s3 is not None:
                    tile = tile + jnp.where(sub8 == 3, s3, 0.0)
                stats_ref[...] = tile.astype(_F32)

            if loss_type in ('online semi-hard', 'online hardest'):
                emit(cost)
            elif loss_type == 'online hardest adv':
                # Arithmetic gather: where cost > margin the clamp was inactive,
                # so scores[idx, i] == cost - margin + sim_ap exactly.
                adv = lambda_value * (cost - margin + sap + 1.0)
                emit(jnp.where(cost > margin, adv, cost))
            else:  # 'online hardest v2' / 'online hardest adv v2'
                pos_l = sap * 10.0                                     # Pos / 0.1
                neg_l = cost * 10.0                                    # Neg / 0.1
                m = jnp.maximum(pos_l, neg_l)
                lse = m + jnp.log(jnp.exp(pos_l - m) + jnp.exp(neg_l - m))
                neg_logsm0 = lse - pos_l                 # -log_softmax(...)[:, 0]
                if loss_type == 'online hardest v2':
                    emit(neg_logsm0)
                else:
                    hard = (cost > sap) | (cost > 0.8)
                    easy = (cost < sap) & (cost < 0.8)
                    emit(jnp.where(hard, cost, 0.0),
                         jnp.where(easy, neg_logsm0, 0.0),
                         hard.astype(_F32), easy.astype(_F32))

    return kernel


def _make_base_kernel(margin, d, bm):
    margin = float(margin)

    def kernel(anc_ref, pos_ref, neg_ref, invn_ref, idx_ref, stats_ref):
        anc32 = anc_ref[...].astype(_F32)                              # (bm, d)
        pos32 = pos_ref[...].astype(_F32)
        neg32 = neg_ref[...].astype(_F32)
        inv_a = jax.lax.rsqrt(jnp.maximum(
            jnp.sum(anc32 * anc32, axis=1, keepdims=True), _EPS))      # (bm, 1)
        inv_p = jax.lax.rsqrt(jnp.maximum(
            jnp.sum(pos32 * pos32, axis=1, keepdims=True), _EPS))
        inv_nb = invn_ref[...]                                         # (bm, 1)
        anc_n = anc32 * inv_a
        # Batch both per-row dot products into a single M=1 MXU matmul.
        prod = jnp.concatenate(
            [anc_n * (pos32 * inv_p), anc_n * (neg32 * inv_nb)], axis=0)  # (2bm, d)
        ones_row = jnp.ones((1, d), _F32)
        s = jax.lax.dot_general(
            ones_row, prod, dimension_numbers=(((1,), (1,)), ((), ())),
            preferred_element_type=_F32)                               # (1, 2bm)
        sim_ap = s[:, :bm]
        sim_an = s[:, bm:]
        cost = jnp.maximum(margin + sim_an - sim_ap, 0.0)
        idx_ref[...] = (pl.program_id(0) * bm
                        + jax.lax.broadcasted_iota(jnp.int32, (1, bm), 1))
        sub8 = jax.lax.broadcasted_iota(jnp.int32, (8, bm), 0)
        stats_ref[...] = jnp.where(sub8 == 0, cost, 0.0).astype(_F32)

    return kernel


@functools.partial(jax.jit,
                   static_argnames=('loss_type', 'margin', 'lambda_value',
                                    'block_rows', 'block_negs', 'use_bf16_scores'))
def triplet_loss_pallas(anc, pos, neg, *, loss_type, margin=0.1, lambda_value=1.0,
                        block_rows=None, block_negs=None, use_bf16_scores=False):
    if loss_type not in _LOSS_TYPES:
        raise NotImplementedError(loss_type)
    n, d = anc.shape

    bm_pref, bn_pref, vmem_budget = _device_defaults()
    bm = block_rows if block_rows is not None else _pick_block(n, bm_pref)
    assert n % bm == 0
    # TODO(synk): when n is not a multiple of 128 the (1,bm)/(8,bm) output blocks
    # are not lane-dense (masked partial stores); pad n in the caller for peak perf.

    in_bytes = jnp.dtype(anc.dtype).itemsize
    if anc.dtype == jnp.bfloat16:
        mm_dtype = jnp.bfloat16
    else:
        mm_dtype = jnp.bfloat16 if use_bf16_scores else _F32
    mm_bytes = jnp.dtype(mm_dtype).itemsize

    # Precompute negative inverse norms ONCE (plain XLA, O(n*d)) instead of
    # re-reducing the whole negative set on every grid step inside the kernel.
    inv_n = jax.lax.rsqrt(jnp.maximum(
        jnp.sum(jnp.square(neg.astype(_F32)), axis=1, keepdims=True), _EPS))  # (n, 1)

    if loss_type == 'base':
        kernel = _make_base_kernel(margin, d, bm)
        grid = (n // bm,)
        in_specs = [
            pl.BlockSpec((bm, d), lambda i: (i, 0)),
            pl.BlockSpec((bm, d), lambda i: (i, 0)),
            pl.BlockSpec((bm, d), lambda i: (i, 0)),
            pl.BlockSpec((bm, 1), lambda i: (i, 0)),
        ]
        out_specs = (pl.BlockSpec((1, bm), lambda i: (0, i)),
                     pl.BlockSpec((8, bm), lambda i: (0, i)))
        scratch_shapes = []
        dim_sem = ("parallel",)
    else:
        bn = block_negs if block_negs is not None else _pick_block(n, bn_pref)
        assert n % bn == 0

        def est(b):
            return (2 * 2 * bm * d * in_bytes      # anc + pos, double-buffered
                    + 2 * b * d * in_bytes         # neg chunk, double-buffered
                    + bm * d * mm_bytes            # scaled-anchor scratch
                    + 6 * b * bm * 4               # live (bn, bm) f32/i32 temps
                    + 2 * b * 4 + (1 << 20))

        # Shrink the neg chunk until the working set fits the scoped-VMEM budget.
        while est(bn) > vmem_budget and bn % 16 == 0:
            bn //= 2

        kernel = _make_tiled_kernel(loss_type, margin, lambda_value,
                                    d, bm, bn, mm_dtype)
        grid = (n // bm, n // bn)
        in_specs = [
            pl.BlockSpec((bm, d), lambda i, j: (i, 0)),
            pl.BlockSpec((bm, d), lambda i, j: (i, 0)),
            pl.BlockSpec((bn, d), lambda i, j: (j, 0)),
            pl.BlockSpec((bn, 1), lambda i, j: (j, 0)),
        ]
        out_specs = (pl.BlockSpec((1, bm), lambda i, j: (0, i)),
                     pl.BlockSpec((8, bm), lambda i, j: (0, i)))
        scratch_shapes = [
            pltpu.VMEM((bm, d), mm_dtype),     # inv_a-scaled anchors (MXU operand)
            pltpu.VMEM((1, bm), _F32),         # sim(anc, pos), lane-arranged
            pltpu.VMEM((1, bm), _F32),         # running max
            pltpu.VMEM((1, bm), jnp.int32),    # running first-argmax
        ]
        dim_sem = ("parallel", "arbitrary")

    idx_rows, stats = pl.pallas_call(
        kernel,
        out_shape=(
            jax.ShapeDtypeStruct((1, n), jnp.int32),     # hardest-negative index
            jax.ShapeDtypeStruct((8, n), jnp.float32),   # per-anchor partial stats
        ),
        grid=grid,
        in_specs=in_specs,
        out_specs=out_specs,
        scratch_shapes=scratch_shapes,
        compiler_params=pltpu.CompilerParams(
            dimension_semantics=dim_sem,
            vmem_limit_bytes=int(vmem_budget)),
    )(anc, pos, neg, inv_n)

    # torch returns int64 indices; we return int32 (x64 disabled by default).
    idx = idx_rows[0]

    # Final O(n) scalar combine (outside the kernel, negligible).
    if loss_type == 'online hardest adv v2':
        loss_hard = jnp.sum(stats[0])
        loss_easy = jnp.sum(stats[1])
        n_hard = jnp.sum(stats[2])
        n_easy = jnp.sum(stats[3])
        bad_hard = jnp.isnan(loss_hard) | (n_hard == 0.0)
        bad_easy = jnp.isnan(loss_easy) | (n_easy == 0.0)
        # TODO(synk): PyTorch prints a warning when a batch has no hard/easy
        # triplets; printing is omitted here.
        loss_hard = jnp.where(bad_hard, 0.0, loss_hard)
        n_hard = jnp.where(bad_hard, 0.0, n_hard)
        loss_easy = jnp.where(bad_easy, 0.0, loss_easy)
        n_easy = jnp.where(bad_easy, 0.0, n_easy)
        total = n_hard + n_easy
        total = jnp.where(total == 0.0, 1.0, total)
        loss = (loss_easy + lambda_value * loss_hard) / total
    else:
        loss = jnp.sum(stats[0]) / float(n)
    return loss, idx


def _ref_triplet(anc, pos, neg, loss_type, margin, lambda_value):
    """Pure-JAX mirror of the PyTorch module (sanity check)."""
    def norm(x):
        return x / jnp.linalg.norm(x, axis=1, keepdims=True)
    anc, pos, neg = norm(anc), norm(pos), norm(neg)
    n = anc.shape[0]
    if loss_type == 'base':
        sim_ap = jnp.sum(anc * pos, axis=1)
        sim_an = jnp.sum(anc * neg, axis=1)
        cost = jnp.maximum(margin + sim_an - sim_ap, 0.0)
        return jnp.mean(cost), jnp.arange(n, dtype=jnp.int32)
    sim_ap = jnp.sum(anc * pos, axis=1, keepdims=True)
    scores = anc @ neg.T
    if loss_type == 'online semi-hard':
        mask = (scores < sim_ap).astype(jnp.float32)
        cost = jnp.maximum(mask * (margin + scores - sim_ap), 0.0)
        return (jnp.mean(jnp.max(cost, axis=1)),
                jnp.argmax(cost, axis=1).astype(jnp.int32))
    if loss_type == 'online hardest':
        cost = jnp.maximum(margin + scores - sim_ap, 0.0)
        return (jnp.mean(jnp.max(cost, axis=1)),
                jnp.argmax(cost, axis=1).astype(jnp.int32))
    if loss_type == 'online hardest adv':
        cost_m = jnp.maximum(margin + scores - sim_ap, 0.0)
        cost = jnp.max(cost_m, axis=1)
        idx = jnp.argmax(cost_m, axis=1)
        mask = (cost > margin).astype(jnp.float32)
        gathered = jnp.take_along_axis(scores, idx[:, None], axis=1)[:, 0] + 1.0
        cost = cost * (1.0 - mask) + lambda_value * gathered * mask
        return jnp.mean(cost), idx.astype(jnp.int32)
    Pos = sim_ap[:, 0]
    Neg = jnp.max(scores, axis=1)
    idx = jnp.argmax(scores, axis=1).astype(jnp.int32)
    logits = jnp.stack([Pos, Neg], axis=1) / 0.1
    neg_logsm0 = -jax.nn.log_softmax(logits, axis=1)[:, 0]
    if loss_type == 'online hardest v2':
        return jnp.mean(neg_logsm0), idx
    hard = (Neg > Pos) | (Neg > 0.8)
    easy = (Neg < Pos) & (Neg < 0.8)
    loss_hard = jnp.sum(jnp.where(hard, Neg, 0.0))
    loss_easy = jnp.sum(jnp.where(easy, neg_logsm0, 0.0))
    n_hard = jnp.sum(hard.astype(jnp.float32))
    n_easy = jnp.sum(easy.astype(jnp.float32))
    bad_hard = jnp.isnan(loss_hard) | (n_hard == 0.0)
    bad_easy = jnp.isnan(loss_easy) | (n_easy == 0.0)
    loss_hard = jnp.where(bad_hard, 0.0, loss_hard)
    n_hard = jnp.where(bad_hard, 0.0, n_hard)
    loss_easy = jnp.where(bad_easy, 0.0, loss_easy)
    n_easy = jnp.where(bad_easy, 0.0, n_easy)
    N = n_hard + n_easy
    N = jnp.where(N == 0.0, 1.0, N)
    return (loss_easy + lambda_value * loss_hard) / N, idx


if __name__ == "__main__":
    key = jax.random.PRNGKey(0)
    n, d = 8, 32  # batch=8, hidden=32
    k1, k2, k3 = jax.random.split(key, 3)
    anc = jax.random.normal(k1, (n, d), jnp.float32)
    pos = jax.random.normal(k2, (n, d), jnp.float32)
    neg = jax.random.normal(k3, (n, d), jnp.float32)

    margin, lambda_value = 0.1, 1.0

    for lt in _LOSS_TYPES:
        loss, idx = triplet_loss_pallas(
            anc, pos, neg, loss_type=lt, margin=margin, lambda_value=lambda_value)
        jax.block_until_ready((loss, idx))
        ref_loss, ref_idx = _ref_triplet(anc, pos, neg, lt, margin, lambda_value)
        assert jnp.allclose(loss, ref_loss, rtol=1e-4, atol=1e-5), (lt, loss, ref_loss)
        assert jnp.all(idx == ref_idx), (lt, idx, ref_idx)

    # Optional bf16 MXU-operand path (opt-in): smoke-check with loose tolerance.
    loss_bf16, _ = triplet_loss_pallas(
        anc, pos, neg, loss_type='online hardest', margin=margin,
        lambda_value=lambda_value, use_bf16_scores=True)
    jax.block_until_ready(loss_bf16)
    ref_loss, _ = _ref_triplet(anc, pos, neg, 'online hardest', margin, lambda_value)
    assert jnp.allclose(loss_bf16, ref_loss, atol=5e-2), (loss_bf16, ref_loss)

    print("KERNEL_OK")
</pallas_src>

<mosaic_0001>
module attributes {stable_mosaic.version = 11 : i64} {
  func.func @kernel(%arg0: i32, %arg1: memref<8x32xf32, #tpu.memory_space<vmem>>, %arg2: memref<8x32xf32, #tpu.memory_space<vmem>>, %arg3: memref<8x32xf32, #tpu.memory_space<vmem>>, %arg4: memref<8x1xf32, #tpu.memory_space<vmem>>, %arg5: memref<1x8xi32, #tpu.memory_space<vmem>>, %arg6: memref<8x8xf32, #tpu.memory_space<vmem>>) attributes {dimension_semantics = [#tpu.dimension_semantics<parallel>], iteration_bounds = array<i64: 1>, scalar_prefetch = 0 : i64, scratch_operands = 0 : i64, tpu.core_type = #tpu.core_type<tc>, window_params = [{transform_indices = @transform_0, window_bounds = array<i64: 8, 32>}, {transform_indices = @transform_1, window_bounds = array<i64: 8, 32>}, {transform_indices = @transform_2, window_bounds = array<i64: 8, 32>}, {transform_indices = @transform_3, window_bounds = array<i64: 8, 1>}, {transform_indices = @transform_4, window_bounds = array<i64: 1, 8>}, {transform_indices = @transform_5, window_bounds = array<i64: 8, 8>}]} {
    %c0 = arith.constant 0 : index
    %c0_0 = arith.constant 0 : index
    %0 = vector.load %arg1[%c0, %c0_0] : memref<8x32xf32, #tpu.memory_space<vmem>>, vector<8x32xf32>
    %c0_1 = arith.constant 0 : index
    %c0_2 = arith.constant 0 : index
    %1 = vector.load %arg2[%c0_1, %c0_2] : memref<8x32xf32, #tpu.memory_space<vmem>>, vector<8x32xf32>
    %c0_3 = arith.constant 0 : index
    %c0_4 = arith.constant 0 : index
    %2 = vector.load %arg3[%c0_3, %c0_4] : memref<8x32xf32, #tpu.memory_space<vmem>>, vector<8x32xf32>
    %3 = arith.mulf %0, %0 : vector<8x32xf32>
    %cst = arith.constant dense<0.000000e+00> : vector<8xf32>
    %4 = vector.multi_reduction <add>, %3, %cst [1] : vector<8x32xf32> to vector<8xf32>
    %5 = vector.shape_cast %4 : vector<8xf32> to vector<8x1xf32>
    %cst_5 = arith.constant 1.000000e-24 : f32
    %6 = vector.broadcast %cst_5 : f32 to vector<8x1xf32>
    %7 = arith.maximumf %5, %6 : vector<8x1xf32>
    %8 = math.rsqrt %7 : vector<8x1xf32>
    %9 = arith.mulf %1, %1 : vector<8x32xf32>
    %cst_6 = arith.constant dense<0.000000e+00> : vector<8xf32>
    %10 = vector.multi_reduction <add>, %9, %cst_6 [1] : vector<8x32xf32> to vector<8xf32>
    %11 = vector.shape_cast %10 : vector<8xf32> to vector<8x1xf32>
    %cst_7 = arith.constant 1.000000e-24 : f32
    %12 = vector.broadcast %cst_7 : f32 to vector<8x1xf32>
    %13 = arith.maximumf %11, %12 : vector<8x1xf32>
    %14 = math.rsqrt %13 : vector<8x1xf32>
    %c0_8 = arith.constant 0 : index
    %c0_9 = arith.constant 0 : index
    %15 = vector.load %arg4[%c0_8, %c0_9] : memref<8x1xf32, #tpu.memory_space<vmem>>, vector<8x1xf32>
    %16 = vector.broadcast %8 : vector<8x1xf32> to vector<8x32xf32>
    %17 = arith.mulf %0, %16 : vector<8x32xf32>
    %18 = vector.broadcast %14 : vector<8x1xf32> to vector<8x32xf32>
    %19 = arith.mulf %1, %18 : vector<8x32xf32>
    %20 = arith.mulf %17, %19 : vector<8x32xf32>
    %21 = vector.broadcast %15 : vector<8x1xf32> to vector<8x32xf32>
    %22 = arith.mulf %2, %21 : vector<8x32xf32>
    %23 = arith.mulf %17, %22 : vector<8x32xf32>
    %24 = tpu.concatenate %20, %23 in 0 : vector<8x32xf32>, vector<8x32xf32> -> vector<16x32xf32>
    %cst_10 = arith.constant 1.000000e+00 : f32
    %25 = vector.broadcast %cst_10 : f32 to vector<1x32xf32>
    %cst_11 = arith.constant dense<0.000000e+00> : vector<1x16xf32>
    %26 = tpu.matmul %25, %24, %cst_11 {dimension_numbers = #tpu.dot_dimension_numbers<[1], [1], [0], [0], [0, 0, 1, 0], [], []>} : vector<1x32xf32>, vector<16x32xf32>, vector<1x16xf32> -> vector<1x16xf32>
    %27 = vector.extract_strided_slice %26 {offsets = [0, 0], sizes = [1, 8], strides = [1, 1]} : vector<1x16xf32> to vector<1x8xf32>
    %28 = vector.extract_strided_slice %26 {offsets = [0, 8], sizes = [1, 8], strides = [1, 1]} : vector<1x16xf32> to vector<1x8xf32>
    %cst_12 = arith.constant 1.000000e-01 : f32
    %29 = vector.broadcast %cst_12 : f32 to vector<1x8xf32>
    %30 = arith.addf %29, %28 : vector<1x8xf32>
    %31 = arith.subf %30, %27 : vector<1x8xf32>
    %cst_13 = arith.constant 0.000000e+00 : f32
    %32 = vector.broadcast %cst_13 : f32 to vector<1x8xf32>
    %33 = arith.maximumf %31, %32 : vector<1x8xf32>
    %c8_i32 = arith.constant 8 : i32
    %34 = arith.muli %arg0, %c8_i32 : i32
    %35 = tpu.iota {dimensions = array<i32: 1>} : vector<1x8xi32>
    %36 = vector.broadcast %34 : i32 to vector<1x8xi32>
    %37 = arith.addi %36, %35 : vector<1x8xi32>
    %c0_14 = arith.constant 0 : index
    %c0_15 = arith.constant 0 : index
    %38 = vector.load %arg5[%c0_14, %c0_15] : memref<1x8xi32, #tpu.memory_space<vmem>>, vector<1x8xi32>
    tpu.vector_store %arg5[%c0_14, %c0_15], %37 {strides = array<i32>} : memref<1x8xi32, #tpu.memory_space<vmem>>, vector<1x8xi32>,
    %39 = tpu.iota {dimensions = array<i32: 0>} : vector<8x8xi32>
    %c0_i32 = arith.constant 0 : i32
    %40 = vector.broadcast %c0_i32 : i32 to vector<8x8xi32>
    %41 = arith.cmpi eq, %39, %40 : vector<8x8xi32>
    %cst_16 = arith.constant 0.000000e+00 : f32
    %42 = vector.shape_cast %33 : vector<1x8xf32> to vector<1x8xf32>
    %43 = vector.broadcast %42 : vector<1x8xf32> to vector<8x8xf32>
    %44 = vector.broadcast %cst_16 : f32 to vector<8x8xf32>
    %45 = arith.select %41, %43, %44 : vector<8x8xi1>, vector<8x8xf32>
    %c0_17 = arith.constant 0 : index
    %c0_18 = arith.constant 0 : index
    %46 = vector.load %arg6[%c0_17, %c0_18] : memref<8x8xf32, #tpu.memory_space<vmem>>, vector<8x8xf32>
    tpu.vector_store %arg6[%c0_17, %c0_18], %45 {strides = array<i32>} : memref<8x8xf32, #tpu.memory_space<vmem>>, vector<8x8xf32>,
    return
  }
  func.func @transform_0(%arg0: i32) -> (i32, i32) {
    %c0_i32 = arith.constant 0 : i32
    %c0_i32_0 = arith.constant 0 : i32
    return %arg0, %c0_i32 : i32, i32
  }
  func.func @transform_1(%arg0: i32) -> (i32, i32) {
    %c0_i32 = arith.constant 0 : i32
    %c0_i32_0 = arith.constant 0 : i32
    return %arg0, %c0_i32 : i32, i32
  }
  func.func @transform_2(%arg0: i32) -> (i32, i32) {
    %c0_i32 = arith.constant 0 : i32
    %c0_i32_0 = arith.constant 0 : i32
    return %arg0, %c0_i32 : i32, i32
  }
  func.func @transform_3(%arg0: i32) -> (i32, i32) {
    %c0_i32 = arith.constant 0 : i32
    %c0_i32_0 = arith.constant 0 : i32
    return %arg0, %c0_i32 : i32, i32
  }
  func.func @transform_4(%arg0: i32) -> (i32, i32) {
    %c0_i32 = arith.constant 0 : i32
    %c0_i32_0 = arith.constant 0 : i32
    return %c0_i32, %arg0 : i32, i32
  }
  func.func @transform_5(%arg0: i32) -> (i32, i32) {
    %c0_i32 = arith.constant 0 : i32
    %c0_i32_0 = arith.constant 0 : i32
    return %c0_i32, %arg0 : i32, i32
  }
}

</mosaic_0001>

<bundles_post_ra>
// kernel: triplet_loss_pallas.1
= control target key start
LH: loop header
LB: loop body
LE: loop exit
PB: predicated region body
PF: predicated region fallthrough
CT: control target
= control target key end

     0   :  { %11 = vsyncpa [#allocation3], 0  ;;  %s531_s0 = inlined_call_operand.hbm [shape: f32[8,32], index: 0, kind: input, shape index: {}]   ;;  %s532_s1 = inlined_call_operand.hbm [shape: f32[8,32], index: 1, kind: input, shape index: {}]   ;;  %s533_s2 = inlined_call_operand.hbm [shape: f32[8,32], index: 2, kind: input, shape index: {}]   ;;  %s534_s3 = inlined_call_operand.hbm [shape: f32[8,1], index: 3, kind: input, shape index: {}]   ;;  %s535_s4 = inlined_call_operand.hbm [shape: s32[1,8], index: 4, kind: output, shape index: {0}]   ;;  %s536_s5 = inlined_call_operand.hbm [shape: f32[8,8], index: 5, kind: output, shape index: {1}]  }
   0x1   :  { %12 = vsyncpa [#allocation6], 0 }
   0x2   :  { %13 = vsyncpa [#allocation9], 0 }
   0x3   :  { %14 = vsyncpa [#allocation4], 0 }
   0x4   :  { %15 = vsyncpa [#allocation12], 0  ;;  %s411_s18 = smov [#allocation5]   ;;  %s412_s20 = smov [#allocation2]  }
   0x5   :  { %s32_s19 = sshll.u32 %s411_s18, 4  ;;  %s22_s21 = sshll.u32 %s412_s20, 4  ;;  %s33_s19 = int_to_ptr.vmem [resolvable:$true] %s32_s19  ;;  %s23_s21 = int_to_ptr.vmem [resolvable:$true] %s22_s21 }
   0x6   :  { %s269_s24 = scalar_lea.hbm %s532_s1, 128 }
   0x7   :  { %p270_p0 = scmp.ne.s32.totalorder %s532_s1, %s269_s24  ;;  %p273_p1 = scmp.lt.u32.totalorder %s269_s24, %s532_s1 }
   0x9   :  { %p275_p2 = pnand %p273_p1, %p270_p0 }
   0xb   :  { %278 = shalt.err (!%p275_p2)
}
   0xc   :  { %s279_s29 = scalar_lea.vmem %s33_s19, 128  ;;  %p284_p4 = scmp.lt.s32.totalorder %s33_s19, %s33_s19 }
   0xd   :  { %p280_p3 = scmp.ne.s32.totalorder %s33_s19, %s279_s29  ;;  %p285_p5 = scmp.lt.s32.totalorder %s279_s29, %s279_s29 }
   0xf   :  { %p286_p6 = por %p285_p5, %p284_p4 }
  0x11   :  { %p287_p7 = pnand %p286_p6, %p280_p3 }
  0x13   :  { %290 = shalt.err (!%p287_p7)
}
  0x14   :  { %35 = dma.hbm_to_vmem [thread:$0]  %s532_s1, 128, %s33_s19, [#allocation6]  }
  0x15   :  { %s291_s9 = scalar_lea.hbm %s531_s0, 128 }
  0x16   :  { %p292_p8 = scmp.ne.s32.totalorder %s531_s0, %s291_s9  ;;  %p295_p9 = scmp.lt.u32.totalorder %s291_s9, %s531_s0 }
  0x18   :  { %p297_p10 = pnand %p295_p9, %p292_p8 }
  0x1a   :  { %300 = shalt.err (!%p297_p10)
}
  0x1b   :  { %s301_s14 = scalar_lea.vmem %s23_s21, 128  ;;  %p306_p12 = scmp.lt.s32.totalorder %s23_s21, %s23_s21 }
  0x1c   :  { %p302_p11 = scmp.ne.s32.totalorder %s23_s21, %s301_s14  ;;  %p307_p13 = scmp.lt.s32.totalorder %s301_s14, %s301_s14 }
  0x1e   :  { %p308_p0 = por %p307_p13, %p306_p12 }
  0x20   :  { %p309_p1 = pnand %p308_p0, %p302_p11 }
  0x22   :  { %312 = shalt.err (!%p309_p1)
}
  0x23   :  { %25 = dma.hbm_to_vmem [thread:$0]  %s531_s0, 128, %s23_s21, [#allocation3]  }
  0x24   :  { %s413_s16 = smov [#allocation7]   ;;  %s414_s18 = smov [#allocation8]  }
  0x25   :  { %s42_s17 = sshll.u32 %s413_s16, 4  ;;  %s52_s19 = sshll.u32 %s414_s18, 4  ;;  %s43_s17 = int_to_ptr.vmem [resolvable:$true] %s42_s17  ;;  %s53_s19 = int_to_ptr.vmem [resolvable:$true] %s52_s19 }
  0x26   :  { %s313_s23 = scalar_lea.hbm %s533_s2, 128 }
  0x27   :  { %p314_p2 = scmp.ne.s32.totalorder %s533_s2, %s313_s23  ;;  %p317_p3 = scmp.lt.u32.totalorder %s313_s23, %s533_s2 }
  0x29   :  { %p319_p4 = pnand %p317_p3, %p314_p2 }
  0x2b   :  { %322 = shalt.err (!%p319_p4)
}
  0x2c   :  { %s323_s0 = scalar_lea.vmem %s43_s17, 128  ;;  %p328_p6 = scmp.lt.s32.totalorder %s43_s17, %s43_s17 }
  0x2d   :  { %p324_p5 = scmp.ne.s32.totalorder %s43_s17, %s323_s0  ;;  %p329_p7 = scmp.lt.s32.totalorder %s323_s0, %s323_s0 }
  0x2f   :  { %p330_p8 = por %p329_p7, %p328_p6 }
  0x31   :  { %p331_p9 = pnand %p330_p8, %p324_p5 }
  0x33   :  { %334 = shalt.err (!%p331_p9)
}
  0x34   :  { %45 = dma.hbm_to_vmem [thread:$0]  %s533_s2, 128, %s43_s17, [#allocation6]  }
  0x35   :  { %s335_s6 = scalar_lea.hbm %s534_s3, 128 }
  0x36   :  { %p336_p10 = scmp.ne.s32.totalorder %s534_s3, %s335_s6  ;;  %p339_p11 = scmp.lt.u32.totalorder %s335_s6, %s534_s3 }
  0x38   :  { %p341_p12 = pnand %p339_p11, %p336_p10 }
  0x3a   :  { %344 = shalt.err (!%p341_p12)
}
  0x3b   :  { %s345_s11 = scalar_lea.vmem %s53_s19, 128  ;;  %p350_p0 = scmp.lt.s32.totalorder %s53_s19, %s53_s19 }
  0x3c   :  { %p346_p13 = scmp.ne.s32.totalorder %s53_s19, %s345_s11  ;;  %p351_p1 = scmp.lt.s32.totalorder %s345_s11, %s345_s11 }
  0x3e   :  { %p352_p2 = por %p351_p1, %p350_p0 }
  0x40   :  { %p353_p3 = pnand %p352_p2, %p346_p13 }
  0x42   :  { %356 = shalt.err (!%p353_p3)
}
  0x43   :  { %55 = dma.hbm_to_vmem [thread:$0]  %s534_s3, 128, %s53_s19, [#allocation9]  }
  0x44   :  { %401 = dma.done.wait [#allocation3], 128  }
  0x45   :  { %402 = vsyncadd [#allocation3], 4294967168 }
  0x46   :  { %403 = dma.done.wait [#allocation6], 256  }
  0x47   :  { %404 = vsyncadd [#allocation6], 4294967040 }
  0x48   :  { %405 = dma.done.wait [#allocation9], 128  }
  0x49   :  { %406 = vsyncadd [#allocation9], 4294967168  ;;  %v415_v0 = vmov 0   ;;  %v68_v1 = vld [vmem:[#allocation2] sm:$0xff]  ;;  %vm72_vm0 = vcmask 261120   ;;  %v69_v2 = vld [vmem:[#allocation5] sm:$0xff]  ;;  %v182_v27 = vlaneseq }
  0x4a   :  { %263 = vset.pattern.permute.xlu1 %v415_v0  ;;  %264 = vset.pattern.permute.xlu0 %v415_v0  ;;  %v84_v3 = vld [vmem:[#allocation8] sm:$0xff]  ;;  %v71_v4 = vmul.f32 %v68_v1, %v68_v1  ;;  %v78_v5 = vmul.f32 %v69_v2, %v69_v2  ;;  %v416_v8 = vmov 0.0|0.0   ;;  %vm417_vm1 = vmmov 0   ;;  %v70_v16 = vld [vmem:[#allocation7] sm:$0xff]  ;;  %vm248_vm2 = vmpackc.low %vm72_vm0, %vm72_vm0  ;;  %s420_s3 = smov 8   ;;  %s421_s13 = smov [#allocation10]  }
  0x4b   :  { %90 = vperm.xlu1 %263, %v84_v3   ;;  %246 = vmatprep.subr.bf16.mxu0 %v416_v8  ;;  %v418_v9 = vmov 0.0   ;;  %v419_v24 = vmov 1.0   ;;  %v183_v28 = vand.u32 127, %v182_v27  ;;  %vm186_vm3 = vcmask 57344   ;;  %s208_s14 = sshll.u32 %s421_s13, 4  ;;  %s209_s14 = int_to_ptr.vmem [resolvable:$true] %s208_s14 }
  0x4c   :  { %v73_v6 = vsel %vm72_vm0, %v71_v4, 0.0  ;;  %v79_v7 = vsel %vm72_vm0, %v78_v5, 0.0  ;;  %243 = vmatprep.mubr.msk.f32.mxu0 %vm417_vm1, %v418_v9  ;;  %s357_s1 = scalar_lea.vmem %s209_s14, 16  ;;  %s361_s15 = scalar_lea.vmem %s209_s14, 32 }
  0x4d   :  { %74 = vadd.xlane.f32.xlu0 %v73_v6  ;;  %187 = vst.msk [vmem:[#allocation10] sm:$0x1] %vm186_vm3, %v183_v28  ;;  %p358_p4 = scmp.ne.s32.totalorder %s209_s14, %s357_s1  ;;  %p362_p5 = scmp.lt.s32.totalorder %s209_s14, %s209_s14 }
  0x4e   :  { %p363_p6 = scmp.lt.s32.totalorder %s361_s15, %s357_s1 }
  0x50   :  { %p364_p7 = por %p363_p6, %p362_p5 }
  0x51   :  { %80 = vadd.xlane.f32.xlu0 %v79_v7 }
  0x52   :  { %p365_p8 = pnand %p364_p7, %p358_p4 }
  0xca   :  { %v91_v15 = vpop.permute.xlu1 %90 }
  0xcb   :  { %v93_v18 = vmul.f32 %v91_v15, %v70_v16 }
  0xda   :  { %v75_v10 = vpop.xlane.xlu0 %74 }
  0xdb   :  { %v76_v11 = vmax.f32 %v75_v10, 1e-24 }
  0xdd   :  { %265 = vrsqrt.f32 %v76_v11 }
  0xde   :  { %v81_v12 = vpop.xlane.xlu0 %80 }
  0xdf   :  { %v82_v13 = vmax.f32 %v81_v12, 1e-24 }
  0xe1   :  { %267 = vrsqrt.f32 %v82_v13 }
  0xe7   :  { %v266_v14 = vpop.eup %265 }
  0xe8   :  { %v85_v17 = vmul.f32 %v266_v14, %v68_v1 }
  0xea   :  { %v94_v21 = vmul.f32 %v93_v18, %v85_v17 }
  0xeb   :  { %v268_v19 = vpop.eup %267 }
  0xec   :  { %v86_v20 = vmul.f32 %v268_v19, %v69_v2 }
  0xee   :  { %v87_v22 = vmul.f32 %v86_v20, %v85_v17 }
  0xf0   :  { %v247_v23 = vpack.c.bf16 %v94_v21, %v87_v22 }
  0xf2   :  { %249 = vmatpush3.bf16.xpose.msk.msra.mxu0 %vm248_vm2, %v247_v23 }
  0xf9   :  { %244 = vmatmul.mubr.msk.f32.vlgmr.msra.gmra.mrb[0].mxu0 %vm72_vm0, %v419_v24 }
 0x1cc   :  { %v170_v25 = vpop.f32.mrb[0].mxu0 }
 0x1cd   :  { %176 = vrot.lane.b32.xlu1 %v170_v25, %s420_s3  ;;  %v245_v26 = vpop.f32.mrb[1].mxu0 }
 0x1ce   :  { %368 = shalt.err (!%p365_p8)
}
 0x1cf   :  { %s369_s18 = scalar_lea.hbm %s535_s4, 16 }
 0x1d0   :  { %p370_p9 = scmp.ne.s32.totalorder %s535_s4, %s369_s18  ;;  %p373_p10 = scmp.lt.u32.totalorder %s369_s18, %s535_s4 }
 0x1d2   :  { %p375_p11 = pnand %p373_p10, %p370_p9 }
 0x1d4   :  { %378 = shalt.err (!%p375_p11)
}
 0x1d5   :  { %211 = dma.vmem_to_hbm [thread:$0]  %s209_s14, 16, %s535_s4, [#allocation4]   ;;  %v189_v29 = vshrl.u32 %v182_v27, 7  ;;  %v174_v30 = vadd.f32 0.1, %v170_v25  ;;  %vm200_vm5 = vcmask 64512  }
 0x1d6   :  { %s422_s26 = smov 120   ;;  %s423_s27 = smov [#allocation11]  }
 0x1d7   :  { %v193_v32 = vsub.s32 0, %v189_v29  ;;  %vm190_vm4 = vcmp.eq.s32.totalorder %v189_v29, 0  ;;  %s218_s0 = sshll.u32 %s423_s27, 4  ;;  %s219_s0 = int_to_ptr.vmem [resolvable:$true] %s218_s0 }
 0x1d8   :  { %s379_s21 = scalar_lea.vmem %s219_s0, 128  ;;  %p384_p13 = scmp.lt.s32.totalorder %s219_s0, %s219_s0 }
 0x1d9   :  { %p380_p12 = scmp.ne.s32.totalorder %s219_s0, %s379_s21  ;;  %p385_p0 = scmp.lt.s32.totalorder %s379_s21, %s379_s21 }
 0x1db   :  { %p386_p1 = por %p385_p0, %p384_p13 }
 0x1dd   :  { %p387_p2 = pnand %p386_p1, %p380_p12 }
 0x23f   :  { %v177_v31 = vpop.permute.xlu1 %176 }
 0x240   :  { %v179_v33 = vsub.f32 %v174_v30, %v177_v31 }
 0x242   :  { %v180_v34 = vmax.f32 %v179_v33, 0.0 }
 0x244   :  { %v194_v35 = vrot.slane %v180_v34, %v193_v32 }
 0x246   :  { %v195_v36 = vsel %vm190_vm4, %v194_v35, 0.0 }
 0x247   :  { %197 = vrot.lane.b32.xlu0 %v195_v36, %s422_s26 }
 0x2b9   :  { %v198_v37 = vpop.permute.xlu0 %197 }
 0x2ba   :  { %201 = vst.msk [vmem:[#allocation11] sm:$0xff] %vm200_vm5, %v198_v37 }
 0x2bb   :  { %390 = shalt.err (!%p387_p2)
}
 0x2bc   :  { %s391_s29 = scalar_lea.hbm %s536_s5, 128 }
 0x2bd   :  { %p392_p3 = scmp.ne.s32.totalorder %s536_s5, %s391_s29  ;;  %p395_p4 = scmp.lt.u32.totalorder %s391_s29, %s536_s5 }
 0x2bf   :  { %p397_p5 = pnand %p395_p4, %p392_p3 }
 0x2c1   :  { %400 = shalt.err (!%p397_p5)
}
 0x2c2   :  { %221 = dma.vmem_to_hbm [thread:$0]  %s219_s0, 128, %s536_s5, [#allocation12]  }
 0x2c3   :  { %407 = dma.done.wait [#allocation4], 16  }
 0x2c4   :  { %408 = vsyncadd [#allocation4], 4294967280 }
 0x2c5   :  { %409 = dma.done.wait [#allocation12], 128  }
 0x2c6   :  { %410 = vsyncadd [#allocation12], 4294967168 }
 0x2c7   :  { %228 = vsyncpa [#allocation3], 1 }
 0x2c8   :  { %229 = vsyncpa [#allocation6], 1 }
 0x2c9   :  { %230 = vsyncpa [#allocation9], 1 }
 0x2ca   :  { %231 = vsyncpa [#allocation4], 1 }
 0x2cb   :  { %232 = vsyncpa [#allocation12], 1 }

</bundles_post_ra>
